<compile_context>
chip_gen: v5e
topology: v5e:2x2
jax: 0.10.0
libtpu: 0.0.40
codegen_flags: <defaults>
</compile_context>

<pallas_src>
import functools
import jax
import jax.numpy as jnp
from jax.experimental import pallas as pl
from jax.experimental.pallas import tpu as pltpu

_EPS = 1e-5


# ------------------------------ tiling helpers ------------------------------

def _pick_tm(M, cap=512):
    """Largest row tile <= cap that divides M (multiple of 8), else full M."""
    if M <= cap:
        return M                       # full dim is always a legal block size
    t = cap - cap % 8
    while t >= 8:
        if M % t == 0:
            return t
        t -= 8
    return cap                         # fallback: requires M padding


def _pick_tn(N, gm):
    if N % 128 != 0:
        return N                       # full dim (e.g. 64-channel stem, fc=10)
    if gm == 1 and N > 128:
        return 128                     # keep >=2 grid steps for megacore
    return 256 if N % 256 == 0 else 128


# ---------------------- fused matmul + bias(+res) + ReLU ---------------------

def _mm_kernel(*refs, relu, has_residual):
    if has_residual:
        a_ref, b_ref, bias_ref, r_ref, o_ref = refs
    else:
        a_ref, b_ref, bias_ref, o_ref = refs
        r_ref = None
    acc = jnp.dot(a_ref[...], b_ref[...], preferred_element_type=jnp.float32)
    acc = acc + bias_ref[...]
    if has_residual:
        acc = acc + r_ref[...].astype(jnp.float32)
    if relu:
        acc = jnp.maximum(acc, 0.0)
    o_ref[...] = acc.astype(o_ref.dtype)


def matmul_bias_act(a, b, bias, *, relu, residual=None, out_dtype=jnp.bfloat16):
    """out = act((a @ b) + bias [+ residual]).  a:(M,K) bf16, b:(K,N) bf16."""
    M, K = a.shape
    Kb, N = b.shape
    assert K == Kb
    a = a.astype(jnp.bfloat16)
    b = b.astype(jnp.bfloat16)

    tm = _pick_tm(M)
    gm = (M + tm - 1) // tm
    Mp = gm * tm
    if Mp != M:                        # fallback path (not hit for ResNet-50)
        a = jnp.pad(a, ((0, Mp - M), (0, 0)))
        if residual is not None:
            residual = jnp.pad(residual, ((0, Mp - M), (0, 0)))
    tn = _pick_tn(N, gm)
    gn = N // tn

    bias2 = bias.reshape(1, N).astype(jnp.float32)
    inputs = [a, b, bias2]
    in_specs = [
        pl.BlockSpec((tm, K), lambda i, j: (i, 0)),
        pl.BlockSpec((K, tn), lambda i, j: (0, j)),
        pl.BlockSpec((1, tn), lambda i, j: (0, j)),
    ]
    has_residual = residual is not None
    if has_residual:
        inputs.append(residual.astype(jnp.bfloat16))
        in_specs.append(pl.BlockSpec((tm, tn), lambda i, j: (i, j)))

    out = pl.pallas_call(
        functools.partial(_mm_kernel, relu=relu, has_residual=has_residual),
        out_shape=jax.ShapeDtypeStruct((Mp, N), out_dtype),
        grid_spec=pltpu.PrefetchScalarGridSpec(
            num_scalar_prefetch=0,
            grid=(gm, gn),
            in_specs=in_specs,
            out_specs=pl.BlockSpec((tm, tn), lambda i, j: (i, j)),
        ),
        compiler_params=pltpu.CompilerParams(
            dimension_semantics=("parallel", "parallel")),
    )(*inputs)
    return out[:M] if Mp != M else out


# ------------------------------- max pooling --------------------------------

def _maxpool_kernel(x_ref, o_ref, *, oh, ow, c):
    # x block: (Hp//2, 2, Wp//2, 2C)  ->  rows split even/odd, cols packed in lanes
    x = x_ref[...]
    ev_r, od_r = x[:, 0], x[:, 1]                       # (Hp//2, Wp//2, 2C)
    rm = jnp.maximum(jnp.maximum(ev_r[:oh], od_r[:oh]), ev_r[1:oh + 1])
    ev_c, od_c = rm[..., :c], rm[..., c:]               # (OH, Wp//2, C)
    o_ref[...] = jnp.maximum(
        jnp.maximum(ev_c[:, :ow, :], od_c[:, :ow, :]), ev_c[:, 1:ow + 1, :])


def maxpool_3x3_s2(x):
    """PyTorch MaxPool2d(kernel_size=3, stride=2, padding=1) on NHWC bf16."""
    N, H, W, C = x.shape
    assert H % 2 == 0 and W % 2 == 0
    OH, OW = H // 2, W // 2
    Hp, Wp = H + 2, W + 2
    xp = jnp.pad(x, ((0, 0), (1, 1), (1, 1), (0, 0)),
                 constant_values=float("-inf"))
    # free reshapes: even/odd rows in a size-2 axis, adjacent columns packed
    # into a 2C-wide lane dimension (keeps DMA / loads lane-dense).
    xr = xp.reshape(N * (Hp // 2), 2, Wp // 2, 2 * C)
    out = pl.pallas_call(
        functools.partial(_maxpool_kernel, oh=OH, ow=OW, c=C),
        out_shape=jax.ShapeDtypeStruct((N * OH, OW, C), x.dtype),
        grid_spec=pltpu.PrefetchScalarGridSpec(
            num_scalar_prefetch=0,
            grid=(N,),
            in_specs=[pl.BlockSpec((Hp // 2, 2, Wp // 2, 2 * C),
                                   lambda n: (n, 0, 0, 0))],
            out_specs=pl.BlockSpec((OH, OW, C), lambda n: (n, 0, 0)),
        ),
        compiler_params=pltpu.CompilerParams(dimension_semantics=("parallel",)),
    )(xr)
    return out.reshape(N, OH, OW, C)


# --------------------------- global average pooling --------------------------

def _avgpool_kernel(x_ref, o_ref):
    x = x_ref[...].astype(jnp.float32)
    o_ref[...] = jnp.mean(x, axis=1, keepdims=True).astype(o_ref.dtype)


def global_avgpool(x):
    """PyTorch AvgPool2d(7, stride=1) on a (N,7,7,C) tensor -> (N,C)."""
    N, H, W, C = x.shape
    a = x.reshape(N, H * W, C)
    out = pl.pallas_call(
        _avgpool_kernel,
        out_shape=jax.ShapeDtypeStruct((N, 1, C), x.dtype),
        grid_spec=pltpu.PrefetchScalarGridSpec(
            num_scalar_prefetch=0,
            grid=(N,),
            in_specs=[pl.BlockSpec((1, H * W, C), lambda n: (n, 0, 0))],
            out_specs=pl.BlockSpec((1, 1, C), lambda n: (n, 0, 0)),
        ),
        compiler_params=pltpu.CompilerParams(dimension_semantics=("parallel",)),
    )(a)
    return out.reshape(N, C)


# ------------------------- conv / bottleneck glue ----------------------------

def _extract_patches(x, kh, kw, stride, pad):
    """im2col (bf16). x:(N,H,W,C) -> (N*OH*OW, kh*kw*C), patch order (kh,kw,C).
    TODO(synk): patches are still materialized in HBM; fusing patch extraction
    into the matmul pipeline (manual DMA of shifted windows) is future work."""
    N, H, W, C = x.shape
    xp = jnp.pad(x, ((0, 0), (pad, pad), (pad, pad), (0, 0)))
    OH = (H + 2 * pad - kh) // stride + 1
    OW = (W + 2 * pad - kw) // stride + 1
    cols = []
    for i in range(kh):
        for j in range(kw):
            cols.append(xp[:, i:i + stride * OH:stride,
                           j:j + stride * OW:stride, :])
    patches = jnp.concatenate(cols, axis=-1)
    return patches.reshape(N * OH * OW, kh * kw * C), OH, OW


def conv_bn_act(x, cp, *, stride, pad, relu, residual=None):
    """Conv2d(bias=False) + folded eval-mode BN (+ residual) + optional ReLU."""
    kh, kw = cp['ksize']
    N, H, W, C = x.shape
    if kh == 1 and kw == 1:
        xs = x[:, ::stride, ::stride, :] if stride > 1 else x
        OH, OW = xs.shape[1], xs.shape[2]
        a = xs.reshape(N * OH * OW, C)
    else:
        a, OH, OW = _extract_patches(x, kh, kw, stride, pad)
    r = None
    if residual is not None:
        r = residual.reshape(N * OH * OW, residual.shape[-1])
    out = matmul_bias_act(a, cp['w'], cp['b'], relu=relu, residual=r)
    return out.reshape(N, OH, OW, cp['w'].shape[1])


def bottleneck_forward(x, bp, stride, with_cs):
    """Bottleneck / Bottleneck_with_CS forward (eval mode)."""
    out = conv_bn_act(x, bp['c1'], stride=1, pad=0, relu=True)
    vec1 = vec2 = None
    if with_cs:
        # TODO(synk): my_op.MyCS channel-selection op has no open
        # implementation; modeled as identity returning a unit scale vector.
        vec1 = jnp.ones((bp['c1']['w'].shape[1],), jnp.float32)
    out = conv_bn_act(out, bp['c2'], stride=stride, pad=1, relu=True)
    if with_cs:
        vec2 = jnp.ones((bp['c2']['w'].shape[1],), jnp.float32)
    if 'ds' in bp:
        residual = conv_bn_act(x, bp['ds'], stride=stride, pad=0, relu=False)
    else:
        residual = x
    # conv3 + bn3 + residual add + ReLU fused in one kernel epilogue.
    out = conv_bn_act(out, bp['c3'], stride=1, pad=0, relu=True,
                      residual=residual)
    return out, vec1, vec2


# ----------------------------- parameter init --------------------------------

def init_resnet50_params(seed=0, num_classes=10):
    """Random (deterministic) weights with eval-mode BN folded & pre-transposed.

    Each conv entry: 'w' (kh*kw*Cin, Cout) bf16 with BN scale folded into the
    columns, 'b' (Cout,) f32 bias, 'ksize' (kh, kw)."""
    layers_cfg = [(64, 3, 1), (128, 4, 2), (256, 6, 2), (512, 3, 2)]
    expansion = 4
    root = jax.random.PRNGKey(seed)
    ctr = [0]

    def nk():
        ctr[0] += 1
        return jax.random.fold_in(root, ctr[0])

    def conv_folded(cout, cin, kh, kw):
        fan_in = cin * kh * kw
        w = (jax.random.normal(nk(), (cout, cin, kh, kw), jnp.float32)
             * jnp.sqrt(2.0 / fan_in))
        gamma = 1.0 + 0.1 * jax.random.normal(nk(), (cout,), jnp.float32)
        beta = 0.1 * jax.random.normal(nk(), (cout,), jnp.float32)
        mean = 0.05 * jax.random.normal(nk(), (cout,), jnp.float32)
        var = 1.0 + 0.1 * jax.random.uniform(nk(), (cout,), jnp.float32)
        scale = gamma / jnp.sqrt(var + _EPS)
        bias = beta - mean * scale
        wk = jnp.transpose(w, (2, 3, 1, 0)).reshape(kh * kw * cin, cout)
        wk = (wk * scale[None, :]).astype(jnp.bfloat16)
        return {'w': wk, 'b': bias.astype(jnp.float32), 'ksize': (kh, kw)}

    params = {'conv1': conv_folded(64, 3, 7, 7), 'layers': []}
    inplanes = 64
    for planes, blocks, stride in layers_cfg:
        layer = []
        for bi in range(blocks):
            cin = inplanes if bi == 0 else planes * expansion
            bp = {
                'c1': conv_folded(planes, cin, 1, 1),
                'c2': conv_folded(planes, planes, 3, 3),
                'c3': conv_folded(planes * expansion, planes, 1, 1),
            }
            if bi == 0 and (stride != 1 or inplanes != planes * expansion):
                bp['ds'] = conv_folded(planes * expansion, inplanes, 1, 1)
            layer.append(bp)
        params['layers'].append(layer)
        inplanes = planes * expansion
    fc_w = (jax.random.normal(nk(), (num_classes, 512 * expansion), jnp.float32)
            * jnp.sqrt(1.0 / (512 * expansion)))
    params['fc_w'] = fc_w.T.astype(jnp.bfloat16)            # (2048, num_classes)
    params['fc_b'] = 0.01 * jax.random.normal(nk(), (num_classes,), jnp.float32)
    return params


# ------------------------------ full forward ---------------------------------

def resnet_forward(params, x_nchw, g_id=0, channel_index=None):
    """Eval-mode forward of ResNet(group_id=g_id, Bottleneck, [3,4,6,3]).

    Returns (logits, scale_vector_list) like the reference forward."""
    # TODO(synk): channel_index is the pruning index consumed by my_op.MyCS in
    # eval mode; MyCS has no open implementation, so it is ignored (identity).
    del channel_index
    x = jnp.transpose(x_nchw, (0, 2, 3, 1)).astype(jnp.bfloat16)   # -> NHWC
    x = conv_bn_act(x, params['conv1'], stride=2, pad=3, relu=True)
    x = maxpool_3x3_s2(x)

    scale_vectors = []
    for li, layer in enumerate(params['layers']):
        layer_stride = 1 if li == 0 else 2
        n_blocks = len(layer)
        for bi, bp in enumerate(layer):
            s = layer_stride if bi == 0 else 1
            # In the reference, layer g_id uses Bottleneck_with_CS except the
            # last block of layer4 when g_id == 3 (plain Bottleneck).
            with_cs = (li == g_id) and not (g_id == 3 and bi == n_blocks - 1)
            x, v1, v2 = bottleneck_forward(x, bp, s, with_cs)
            if with_cs:
                scale_vectors.extend([v1, v2])

    feat = global_avgpool(x)                                  # (N, 2048) bf16
    logits = matmul_bias_act(feat, params['fc_w'], params['fc_b'],
                             relu=False, out_dtype=jnp.float32)
    return logits, scale_vectors


# ----------------------------------- main ------------------------------------

if __name__ == "__main__":
    # Smallest shapes consistent with the module: AvgPool2d(7) after layer4
    # forces 224x224 spatial input; batch=1, num_classes=10.
    key = jax.random.PRNGKey(0)
    x = jax.random.normal(key, (1, 3, 224, 224), jnp.float32)   # NCHW input
    params = init_resnet50_params(seed=0, num_classes=10)

    logits, scale_vecs = resnet_forward(params, x, g_id=0)
    logits = jax.block_until_ready(logits)
    for v in scale_vecs:
        jax.block_until_ready(v)

    assert logits.shape == (1, 10)
    assert len(scale_vecs) == 6                 # g_id=0 -> 3 CS blocks x 2 vecs
    assert bool(jnp.all(jnp.isfinite(logits)))
    print("KERNEL_OK")
</pallas_src>

<mosaic_0001>
module attributes {stable_mosaic.version = 11 : i64} {
  func.func @_mm_kernel(%arg0: i32, %arg1: i32, %arg2: memref<448x147xbf16, #tpu.memory_space<vmem>>, %arg3: memref<147x64xbf16, #tpu.memory_space<vmem>>, %arg4: memref<1x64xf32, #tpu.memory_space<vmem>>, %arg5: memref<448x64xbf16, #tpu.memory_space<vmem>>) attributes {dimension_semantics = [#tpu.dimension_semantics<parallel>, #tpu.dimension_semantics<parallel>], iteration_bounds = array<i64: 28, 1>, scalar_prefetch = 0 : i64, scratch_operands = 0 : i64, tpu.core_type = #tpu.core_type<tc>, window_params = [{transform_indices = @transform_0, window_bounds = array<i64: 448, 147>}, {transform_indices = @transform_1, window_bounds = array<i64: 147, 64>}, {transform_indices = @transform_2, window_bounds = array<i64: 1, 64>}, {transform_indices = @transform_3, window_bounds = array<i64: 448, 64>}]} {
    %c0 = arith.constant 0 : index
    %c0_0 = arith.constant 0 : index
    %0 = vector.load %arg2[%c0, %c0_0] : memref<448x147xbf16, #tpu.memory_space<vmem>>, vector<448x147xbf16>
    %c0_1 = arith.constant 0 : index
    %c0_2 = arith.constant 0 : index
    %1 = vector.load %arg3[%c0_1, %c0_2] : memref<147x64xbf16, #tpu.memory_space<vmem>>, vector<147x64xbf16>
    %cst = arith.constant dense<0.000000e+00> : vector<448x64xf32>
    %2 = tpu.matmul %0, %1, %cst {dimension_numbers = #tpu.dot_dimension_numbers<[1], [0], [0], [1], [0, 0, 1, 1], [], []>} : vector<448x147xbf16>, vector<147x64xbf16>, vector<448x64xf32> -> vector<448x64xf32>
    %c0_3 = arith.constant 0 : index
    %c0_4 = arith.constant 0 : index
    %3 = vector.load %arg4[%c0_3, %c0_4] : memref<1x64xf32, #tpu.memory_space<vmem>>, vector<1x64xf32>
    %4 = vector.broadcast %3 : vector<1x64xf32> to vector<448x64xf32>
    %5 = arith.addf %2, %4 : vector<448x64xf32>
    %cst_5 = arith.constant 0.000000e+00 : f32
    %6 = vector.broadcast %cst_5 : f32 to vector<448x64xf32>
    %7 = arith.maximumf %5, %6 : vector<448x64xf32>
    %8 = arith.truncf %7 : vector<448x64xf32> to vector<448x64xbf16>
    %c0_6 = arith.constant 0 : index
    %c0_7 = arith.constant 0 : index
    %9 = vector.load %arg5[%c0_6, %c0_7] : memref<448x64xbf16, #tpu.memory_space<vmem>>, vector<448x64xbf16>
    tpu.vector_store %arg5[%c0_6, %c0_7], %8 {strides = array<i32>} : memref<448x64xbf16, #tpu.memory_space<vmem>>, vector<448x64xbf16>,
    return
  }
  func.func @transform_0(%arg0: i32, %arg1: i32) -> (i32, i32) {
    %c0_i32 = arith.constant 0 : i32
    %c0_i32_0 = arith.constant 0 : i32
    return %arg0, %c0_i32 : i32, i32
  }
  func.func @transform_1(%arg0: i32, %arg1: i32) -> (i32, i32) {
    %c0_i32 = arith.constant 0 : i32
    %c0_i32_0 = arith.constant 0 : i32
    return %c0_i32, %arg1 : i32, i32
  }
  func.func @transform_2(%arg0: i32, %arg1: i32) -> (i32, i32) {
    %c0_i32 = arith.constant 0 : i32
    %c0_i32_0 = arith.constant 0 : i32
    return %c0_i32, %arg1 : i32, i32
  }
  func.func @transform_3(%arg0: i32, %arg1: i32) -> (i32, i32) {
    %c0_i32 = arith.constant 0 : i32
    return %arg0, %arg1 : i32, i32
  }
}

</mosaic_0001>

<bundles_post_ra>
// kernel: tpu_custom_call.1
= control target key start
LH: loop header
LB: loop body
LE: loop exit
PB: predicated region body
PF: predicated region fallthrough
CT: control target
= control target key end

     0   :  { %s1725_s12 = smov 0   ;;  %s1727_s13 = smov 0   ;;  %s2148_s0 = inlined_call_operand.vmem [shape: bf16[12544,147], index: 0, kind: input, shape index: {}]   ;;  %s2149_s1 = inlined_call_operand.vmem [shape: bf16[147,64], index: 1, kind: input, shape index: {}]   ;;  %s2150_s2 = inlined_call_operand.vmem [shape: f32[1,64], index: 2, kind: input, shape index: {}]   ;;  %s2151_s3 = inlined_call_operand.vmem [shape: bf16[12544,64], index: 3, kind: output, shape index: {}]  }
   0x1   :  { %s1729_s14 = smov 0  }
   0x2 LB: > { %s25_s15 = sadd.s32 1, %s1698_s13  ;;  %p1284_p0 = scmp.ge.s32.totalorder %s1702_s14, 1  ;;  %s1702_s14 = sphi %s1729_s14, %s13_s14   ;;  %s1698_s13 = sphi %s1727_s13, %s2153_s13   ;;  %s1694_s12 = sphi %s1725_s12, %s2152_s12  }
   0x3   : > { %p27_p1 = scmp.ge.s32.totalorder %s25_s15, 28  ;;  %p170_p2 = scmp.lt.s32.totalorder %s1702_s14, 29 }
   0x5   : > { %s2155_s15 = smov (%p27_p1, %s25_s15), 0  ;;  %p171_p3 = pnand %p1284_p0, %p170_p2 }
   0x6   : > { %s205_s20 = smul.u32 (!%p171_p3), 56, %s1694_s12 }
   0x7   : > { %174 = sbr.rel (%p171_p3) target bundleno = 401 (0x191), region = 32 }
   0x8   : > { %p206_p4 = scmp.lt.s32.totalorder (!%p171_p3), %s205_s20, 1567 }
   0xc   : > { %v1642_v0 = vld [vmem:[%s2149_s1 + $0x38] sm:$0xff]  ;;  %v303_v1 = vld [vmem:[%s2149_s1 + $0x48] sm:$0x3]  ;;  %vm702_vm0 = vcmask 1040384   ;;  %vm703_vm1 = vcmask 1041408   ;;  %v1641_v3 = vld [vmem:[%s2149_s1 + $0x30] sm:$0xff] }
   0xd   : > { %v597_v2 = vunpack.c.l.b16 %v303_v1  ;;  %709 = vmatpush.bf16.msra.mxu0 %v1642_v0  ;;  %1644 = vmatpush.bf16.msra.mxu2 %v1642_v0  ;;  %v1704_v4 = vmov 65535   ;;  %s2157_s20 = smov (!%p206_p4, %s205_s20), 1567  ;;  %v1640_v9 = vld [vmem:[%s2149_s1 + $0x28] sm:$0xff]  ;;  %v1643_v10 = vld [vmem:[%s2149_s1 + $0x40] sm:$0xff]  ;;  %vm617_vm2 = vcmask 154624   ;;  %v1638_v18 = vld [vmem:[%s2149_s1 + $0x18] sm:$0xff] }
   0xe   : > { %v704_v5 = vsel %vm702_vm0, 4294967295, %v1704_v4  ;;  %s1578_s27 = sshll.u32 %s2157_s20, 3  ;;  %v1639_v14 = vld [vmem:[%s2149_s1 + $0x20] sm:$0xff]  ;;  %v1637_v19 = vld [vmem:[%s2149_s1 + $0x10] sm:$0xff]  ;;  %v1636_v20 = vld [vmem:[%s2149_s1 + $0x8] sm:$0xff]  ;;  %s1287_s19 = sshll.u32 %s2157_s20, 2 }
   0xf   : > { %v607_v6 = vpack.c.b16 %v597_v2, %v597_v2  ;;  %v705_v7 = vsel %vm703_vm1, %v704_v5, 0  ;;  %s1764_s30 = scalar_lea.vmem %s2148_s0, %s1578_s27  ;;  %v1635_v26 = vld [vmem:[%s2149_s1] sm:$0xff]  ;;  %s1893_s23 = scalar_lea.vmem %s2151_s3, %s1287_s19  ;;  %vm1119_vm3 = vcmask 519168  }
  0x10   : > { %v1579_v11 = vld [vmem:[%s1764_s30 + $0x4] sm:$0xf]  ;;  %v1292_v12 = vld [vmem:[%s1764_s30 + $0x8] sm:$0xf0]  ;;  %v1609_v15 = vld [vmem:[%s1764_s30 + $0xf4] sm:$0xf] }
  0x11   : > { %v707_v8 = vand.u32 %v705_v7, %v607_v6  ;;  %710 = vmatpush.bf16.msra.mxu0 %v1641_v3  ;;  %1645 = vmatpush.bf16.msra.mxu2 %v1641_v3  ;;  %v1295_v13 = vor.u32 %v1579_v11, %v1292_v12  ;;  %v1412_v16 = vld [vmem:[%s1764_s30 + $0xf8] sm:$0xf0]  ;;  %v1581_v21 = vld [vmem:[%s1764_s30 + $0x14] sm:$0xf]  ;;  %v1611_v23 = vld [vmem:[%s1764_s30 + $0x104] sm:$0xf] }
  0x12   : > { %v1415_v17 = vor.u32 %v1609_v15, %v1412_v16  ;;  %v1300_v22 = vld [vmem:[%s1764_s30 + $0x18] sm:$0xf0]  ;;  %v1420_v24 = vld [vmem:[%s1764_s30 + $0x108] sm:$0xf0]  ;;  %v1290_v27 = vld [vmem:[%s1764_s30] sm:$0xf] }
  0x13   : > { %864 = vmatpush.bf16.msra.mxu1 %v707_v8  ;;  %1652 = vmatpush.bf16.msra.mxu3 %v707_v8  ;;  %v1303_v25 = vor.u32 %v1581_v21, %v1300_v22  ;;  %v1580_v28 = vld [vmem:[%s1764_s30 + $0x4] sm:$0xf0]  ;;  %v1402_v29 = vld [vmem:[%s1764_s30 + $0xe0] sm:$0xf]  ;;  %v1423_v31 = vor.u32 %v1611_v23, %v1420_v24  ;;  %v1583_v34 = vld [vmem:[%s1764_s30 + $0x24] sm:$0xf] }
  0x14   : > { %v1608_v30 = vld [vmem:[%s1764_s30 + $0xe4] sm:$0xf0]  ;;  %v1291_v32 = vor.u32 %v1580_v28, %v1290_v27  ;;  %v1308_v35 = vld [vmem:[%s1764_s30 + $0x28] sm:$0xf0]  ;;  %v1613_v36 = vld [vmem:[%s1764_s30 + $0x114] sm:$0xf] }
  0x15   : > { %711 = vmatpush.bf16.msra.mxu0 %v1640_v9  ;;  %1646 = vmatpush.bf16.msra.mxu2 %v1640_v9  ;;  %v1403_v33 = vor.u32 %v1608_v30, %v1402_v29  ;;  %v1428_v37 = vld [vmem:[%s1764_s30 + $0x118] sm:$0xf0]  ;;  %v1311_v38 = vor.u32 %v1583_v34, %v1308_v35  ;;  %v1298_v39 = vld [vmem:[%s1764_s30 + $0x10] sm:$0xf]  ;;  %v1582_v40 = vld [vmem:[%s1764_s30 + $0x14] sm:$0xf0] }
  0x16   : > { %v1410_v41 = vld [vmem:[%s1764_s30 + $0xf0] sm:$0xf]  ;;  %v1610_v42 = vld [vmem:[%s1764_s30 + $0xf4] sm:$0xf0]  ;;  %v1431_v43 = vor.u32 %v1613_v36, %v1428_v37  ;;  %v1299_v44 = vor.u32 %v1582_v40, %v1298_v39  ;;  %v1585_v46 = vld [vmem:[%s1764_s30 + $0x34] sm:$0xf] }
  0x17   : > { %865 = vmatpush.bf16.msra.mxu1 %v1643_v10  ;;  %1653 = vmatpush.bf16.msra.mxu3 %v1643_v10  ;;  %v1411_v45 = vor.u32 %v1610_v42, %v1410_v41  ;;  %v1316_v47 = vld [vmem:[%s1764_s30 + $0x38] sm:$0xf0]  ;;  %v1615_v48 = vld [vmem:[%s1764_s30 + $0x124] sm:$0xf]  ;;  %v1436_v49 = vld [vmem:[%s1764_s30 + $0x128] sm:$0xf0] }
  0x18   : > { %v1319_v50 = vor.u32 %v1585_v46, %v1316_v47  ;;  %v1306_v51 = vld [vmem:[%s1764_s30 + $0x20] sm:$0xf]  ;;  %v1584_v52 = vld [vmem:[%s1764_s30 + $0x24] sm:$0xf0]  ;;  %v1439_v55 = vor.u32 %v1615_v48, %v1436_v49  ;;  %v1587_v58 = vld [vmem:[%s1764_s30 + $0x44] sm:$0xf] }
  0x19   : > { %712 = vmatpush.bf16.msra.mxu0 %v1639_v14  ;;  %1647 = vmatpush.bf16.msra.mxu2 %v1639_v14  ;;  %v1418_v53 = vld [vmem:[%s1764_s30 + $0x100] sm:$0xf]  ;;  %v1612_v54 = vld [vmem:[%s1764_s30 + $0x104] sm:$0xf0]  ;;  %v1307_v56 = vor.u32 %v1584_v52, %v1306_v51  ;;  %v1324_v59 = vld [vmem:[%s1764_s30 + $0x48] sm:$0xf0] }
  0x1a   : > { %1548 = vmatmul.msk.bf16.vlgmr.msra.gmra.mxu1 %vm617_vm2, %v1295_v13  ;;  %1563 = vmatmul.msk.bf16.vlgmr.msra.gmra.mxu3 %vm617_vm2, %v1415_v17  ;;  %v1419_v57 = vor.u32 %v1612_v54, %v1418_v53  ;;  %v1617_v60 = vld [vmem:[%s1764_s30 + $0x134] sm:$0xf]  ;;  %v1444_v61 = vld [vmem:[%s1764_s30 + $0x138] sm:$0xf0]  ;;  %v1327_v62 = vor.u32 %v1587_v58, %v1324_v59  ;;  %v1314_v63 = vld [vmem:[%s1764_s30 + $0x30] sm:$0xf] }
  0x1b   : > { %v1586_v0 = vld [vmem:[%s1764_s30 + $0x34] sm:$0xf0]  ;;  %v1426_v1 = vld [vmem:[%s1764_s30 + $0x110] sm:$0xf]  ;;  %v1447_v3 = vor.u32 %v1617_v60, %v1444_v61  ;;  %v1589_v6 = vld [vmem:[%s1764_s30 + $0x54] sm:$0xf] }
  0x1c   : > { %v1614_v2 = vld [vmem:[%s1764_s30 + $0x114] sm:$0xf0]  ;;  %v1315_v4 = vor.u32 %v1586_v0, %v1314_v63  ;;  %v1332_v7 = vld [vmem:[%s1764_s30 + $0x58] sm:$0xf0]  ;;  %v1619_v8 = vld [vmem:[%s1764_s30 + $0x144] sm:$0xf] }
  0x1d   : > { %713 = vmatpush.bf16.msra.mxu0 %v1638_v18  ;;  %1648 = vmatpush.bf16.msra.mxu2 %v1638_v18  ;;  %v1427_v5 = vor.u32 %v1614_v2, %v1426_v1  ;;  %v1452_v9 = vld [vmem:[%s1764_s30 + $0x148] sm:$0xf0]  ;;  %v1335_v10 = vor.u32 %v1589_v6, %v1332_v7  ;;  %v1322_v11 = vld [vmem:[%s1764_s30 + $0x40] sm:$0xf]  ;;  %v1588_v12 = vld [vmem:[%s1764_s30 + $0x44] sm:$0xf0] }
  0x1e   : > { %v1434_v13 = vld [vmem:[%s1764_s30 + $0x120] sm:$0xf]  ;;  %v1616_v14 = vld [vmem:[%s1764_s30 + $0x124] sm:$0xf0]  ;;  %v1455_v15 = vor.u32 %v1619_v8, %v1452_v9  ;;  %v1323_v16 = vor.u32 %v1588_v12, %v1322_v11  ;;  %v1591_v18 = vld [vmem:[%s1764_s30 + $0x64] sm:$0xf] }
  0x1f   : > { %v1435_v17 = vor.u32 %v1616_v14, %v1434_v13  ;;  %v1460_v21 = vld [vmem:[%s1764_s30 + $0x158] sm:$0xf0]  ;;  %v1330_v23 = vld [vmem:[%s1764_s30 + $0x50] sm:$0xf]  ;;  %v1590_v24 = vld [vmem:[%s1764_s30 + $0x54] sm:$0xf0] }
  0x20   : > { %v1331_v28 = vor.u32 %v1590_v24, %v1330_v23  ;;  %v1593_v30 = vld [vmem:[%s1764_s30 + $0x74] sm:$0xf]  ;;  %v1338_v35 = vld [vmem:[%s1764_s30 + $0x60] sm:$0xf]  ;;  %v1592_v36 = vld [vmem:[%s1764_s30 + $0x64] sm:$0xf0] }
  0x21   : > { %714 = vmatpush.bf16.msra.mxu0 %v1637_v19  ;;  %1649 = vmatpush.bf16.msra.mxu2 %v1637_v19  ;;  %v1340_v19 = vld [vmem:[%s1764_s30 + $0x68] sm:$0xf0]  ;;  %v1450_v37 = vld [vmem:[%s1764_s30 + $0x140] sm:$0xf]  ;;  %v1339_v40 = vor.u32 %v1592_v36, %v1338_v35  ;;  %v1595_v42 = vld [vmem:[%s1764_s30 + $0x84] sm:$0xf] }
  0x22   : > { %v1343_v22 = vor.u32 %v1591_v18, %v1340_v19  ;;  %v1346_v47 = vld [vmem:[%s1764_s30 + $0x70] sm:$0xf]  ;;  %v1594_v48 = vld [vmem:[%s1764_s30 + $0x74] sm:$0xf0]  ;;  %v1364_v58 = vld [vmem:[%s1764_s30 + $0x98] sm:$0xf0] }
  0x23   : > { %v1622_v51 = vld [vmem:[%s1764_s30 + $0x154] sm:$0xf0]  ;;  %v1347_v53 = vor.u32 %v1594_v48, %v1346_v47  ;;  %v1627_v59 = vld [vmem:[%s1764_s30 + $0x184] sm:$0xf]  ;;  %v1484_v60 = vld [vmem:[%s1764_s30 + $0x188] sm:$0xf0] }
  0x24   : > { %v1596_v63 = vld [vmem:[%s1764_s30 + $0x84] sm:$0xf0]  ;;  %v1880_v2 = vld [vmem:[%s2150_s2] ss:$0 sm:$0xff]  ;;  %v1599_v18 = vld [vmem:[%s1764_s30 + $0xa4] sm:$0xf] }
  0x25   : > { %715 = vmatpush.bf16.msra.mxu0 %v1636_v20  ;;  %1650 = vmatpush.bf16.msra.mxu2 %v1636_v20  ;;  %v1621_v20 = vld [vmem:[%s1764_s30 + $0x154] sm:$0xf]  ;;  %v1372_v19 = vld [vmem:[%s1764_s30 + $0xa8] sm:$0xf0]  ;;  %v1362_v24 = vld [vmem:[%s1764_s30 + $0x90] sm:$0xf] }
  0x26   : > { %v1463_v27 = vor.u32 %v1621_v20, %v1460_v21  ;;  %v1629_v21 = vld [vmem:[%s1764_s30 + $0x194] sm:$0xf]  ;;  %v1375_v23 = vor.u32 %v1599_v18, %v1372_v19  ;;  %v1380_v48 = vld [vmem:[%s1764_s30 + $0xb8] sm:$0xf0] }
  0x27   : > { %v1601_v47 = vld [vmem:[%s1764_s30 + $0xb4] sm:$0xf] }
  0x29   : > { %716 = vmatpush.bf16.msra.mxu0 %v1635_v26  ;;  %1651 = vmatpush.bf16.msra.mxu2 %v1635_v26  ;;  %v1618_v26 = vld [vmem:[%s1764_s30 + $0x134] sm:$0xf0] }
  0x2a   : > { %1549 = vmatmul.msk.bf16.gmra.mxu1 %vm617_vm2, %v1303_v25  ;;  %1564 = vmatmul.msk.bf16.gmra.mxu3 %vm617_vm2, %v1423_v31  ;;  %v1442_v25 = vld [vmem:[%s1764_s30 + $0x130] sm:$0xf]  ;;  %v1348_v31 = vld [vmem:[%s1764_s30 + $0x78] sm:$0xf0] }
  0x2b   : > { %v1443_v29 = vor.u32 %v1618_v26, %v1442_v25  ;;  %v1351_v34 = vor.u32 %v1593_v30, %v1348_v31  ;;  %v1598_v25 = vld [vmem:[%s1764_s30 + $0x94] sm:$0xf0] }
  0x2c   : > { %717 = vmatmul.bf16.vlgmr.msra.gmra.mxu0 %v1291_v32  ;;  %787 = vmatmul.bf16.vlgmr.msra.gmra.mxu2 %v1403_v33  ;;  %v1623_v32 = vld [vmem:[%s1764_s30 + $0x164] sm:$0xf]  ;;  %v1468_v33 = vld [vmem:[%s1764_s30 + $0x168] sm:$0xf0]  ;;  %v1626_v30 = vld [vmem:[%s1764_s30 + $0x174] sm:$0xf0] }
  0x2d   : > { %v1471_v39 = vor.u32 %v1623_v32, %v1468_v33 }
  0x3a   : > { %1550 = vmatmul.msk.bf16.gmra.mxu1 %vm617_vm2, %v1311_v38  ;;  %1565 = vmatmul.msk.bf16.gmra.mxu3 %vm617_vm2, %v1431_v43  ;;  %v1620_v38 = vld [vmem:[%s1764_s30 + $0x144] sm:$0xf0]  ;;  %v1356_v43 = vld [vmem:[%s1764_s30 + $0x88] sm:$0xf0] }
  0x3b   : > { %v1451_v41 = vor.u32 %v1620_v38, %v1450_v37  ;;  %v1359_v46 = vor.u32 %v1595_v42, %v1356_v43 }
  0x3c   : > { %722 = vmatmul.bf16.gmra.mxu0 %v1299_v44  ;;  %792 = vmatmul.bf16.gmra.mxu2 %v1411_v45  ;;  %v1625_v44 = vld [vmem:[%s1764_s30 + $0x174] sm:$0xf]  ;;  %v1476_v45 = vld [vmem:[%s1764_s30 + $0x178] sm:$0xf0] }
  0x3d   : > { %v1479_v52 = vor.u32 %v1625_v44, %v1476_v45 }
  0x4a   : > { %1551 = vmatmul.msk.bf16.gmra.mxu1 %vm617_vm2, %v1319_v50  ;;  %1566 = vmatmul.msk.bf16.gmra.mxu3 %vm617_vm2, %v1439_v55  ;;  %v1458_v50 = vld [vmem:[%s1764_s30 + $0x150] sm:$0xf] }
  0x4b   : > { %v1459_v54 = vor.u32 %v1622_v51, %v1458_v50  ;;  %v1631_v51 = vld [vmem:[%s1764_s30 + $0x1a4] sm:$0xf] }
  0x4c   : > { %727 = vmatmul.bf16.gmra.mxu0 %v1307_v56  ;;  %797 = vmatmul.bf16.gmra.mxu2 %v1419_v57  ;;  %v1597_v57 = vld [vmem:[%s1764_s30 + $0x94] sm:$0xf] }
  0x4d   : > { %v1367_v61 = vor.u32 %v1597_v57, %v1364_v58  ;;  %v1600_v57 = vld [vmem:[%s1764_s30 + $0xa4] sm:$0xf0] }
  0x5a   : > { %1552 = vmatmul.msk.bf16.gmra.mxu1 %vm617_vm2, %v1327_v62  ;;  %1567 = vmatmul.msk.bf16.gmra.mxu3 %vm617_vm2, %v1447_v3  ;;  %v1354_v62 = vld [vmem:[%s1764_s30 + $0x80] sm:$0xf] }
  0x5b   : > { %v1466_v3 = vld [vmem:[%s1764_s30 + $0x160] sm:$0xf]  ;;  %v1355_v6 = vor.u32 %v1596_v63, %v1354_v62  ;;  %v1628_v62 = vld [vmem:[%s1764_s30 + $0x184] sm:$0xf0] }
  0x5c   : > { %732 = vmatmul.bf16.gmra.mxu0 %v1315_v4  ;;  %802 = vmatmul.bf16.gmra.mxu2 %v1427_v5  ;;  %v1624_v4 = vld [vmem:[%s1764_s30 + $0x164] sm:$0xf0]  ;;  %v1487_v5 = vor.u32 %v1627_v59, %v1484_v60 }
  0x5d   : > { %v1467_v8 = vor.u32 %v1624_v4, %v1466_v3 }
  0x6a   : > { %1553 = vmatmul.msk.bf16.gmra.mxu1 %vm617_vm2, %v1335_v10  ;;  %1568 = vmatmul.msk.bf16.gmra.mxu3 %vm617_vm2, %v1455_v15 }
  0x6c   : > { %737 = vmatmul.bf16.gmra.mxu0 %v1323_v16  ;;  %807 = vmatmul.bf16.gmra.mxu2 %v1435_v17 }
  0x7a   : > { %1554 = vmatmul.msk.bf16.gmra.mxu1 %vm617_vm2, %v1343_v22  ;;  %1569 = vmatmul.msk.bf16.gmra.mxu3 %vm617_vm2, %v1463_v27  ;;  %v1492_v22 = vld [vmem:[%s1764_s30 + $0x198] sm:$0xf0] }
  0x7b   : > { %v1495_v31 = vor.u32 %v1629_v21, %v1492_v22  ;;  %v1603_v22 = vld [vmem:[%s1764_s30 + $0xc4] sm:$0xf] }
  0x7c   : > { %742 = vmatmul.bf16.gmra.mxu0 %v1331_v28  ;;  %812 = vmatmul.bf16.gmra.mxu2 %v1443_v29  ;;  %v1474_v29 = vld [vmem:[%s1764_s30 + $0x170] sm:$0xf] }
  0x7d   : > { %v1475_v36 = vor.u32 %v1626_v30, %v1474_v29 }
  0x8a   : > { %1555 = vmatmul.msk.bf16.gmra.mxu1 %vm617_vm2, %v1351_v34  ;;  %1570 = vmatmul.msk.bf16.gmra.mxu3 %vm617_vm2, %v1471_v39  ;;  %v1363_v34 = vor.u32 %v1598_v25, %v1362_v24 }
  0x8c   : > { %747 = vmatmul.bf16.gmra.mxu0 %v1339_v40  ;;  %817 = vmatmul.bf16.gmra.mxu2 %v1451_v41 }
  0x97   : > { %v867_v49 = vpop.f32.mrf.mxu1 }
  0x9a   : > { %1556 = vmatmul.msk.bf16.gmra.mxu1 %vm617_vm2, %v1359_v46  ;;  %1571 = vmatmul.msk.bf16.gmra.mxu3 %vm617_vm2, %v1479_v52  ;;  %v1500_v52 = vld [vmem:[%s1764_s30 + $0x1a8] sm:$0xf0] }
  0x9b   : > { %v1503_v63 = vor.u32 %v1631_v51, %v1500_v52 }
  0x9c   : > { %752 = vmatmul.bf16.gmra.mxu0 %v1347_v53  ;;  %822 = vmatmul.bf16.gmra.mxu2 %v1459_v54  ;;  %v1383_v54 = vor.u32 %v1601_v47, %v1380_v48 }
  0x9d   : > { %v1867_v55 = vpop.f32.mrf.mxu3 }
  0x9f   : > { %v869_v56 = vpop.f32.mrf.mxu1 }
  0xa5   : > { %v1875_v0 = vpop.f32.mrf.mxu3 }
  0xa7   : > { %v872_v1 = vpop.f32.mrf.mxu1 }
  0xa9   : > { %v718_v7 = vpop.f32.mrf.mxu0 }
  0xaa   : > { %1557 = vmatmul.msk.bf16.gmra.mxu1 %vm617_vm2, %v1367_v61  ;;  %v719_v9 = vadd.f32 %v1880_v2, %v718_v7  ;;  %1572 = vmatmul.msk.bf16.gmra.mxu3 %vm617_vm2, %v1487_v5  ;;  %v1482_v61 = vld [vmem:[%s1764_s30 + $0x180] sm:$0xf] }
  0xab   : > { %v1483_v7 = vor.u32 %v1628_v62, %v1482_v61  ;;  %v1605_v61 = vld [vmem:[%s1764_s30 + $0xd4] sm:$0xf]  ;;  %v1396_v62 = vld [vmem:[%s1764_s30 + $0xd8] sm:$0xf0] }
  0xac   : > { %v868_v10 = vadd.f32 %v867_v49, %v719_v9  ;;  %757 = vmatmul.bf16.gmra.mxu0 %v1355_v6  ;;  %827 = vmatmul.bf16.gmra.mxu2 %v1467_v8 }
  0xad   : > { %v1888_v11 = vpop.f32.mrf.mxu3 }
  0xae   : > { %v1007_v12 = vmax.f32 %v868_v10, 0.0 }
  0xaf   : > { %v874_v13 = vpop.f32.mrf.mxu1  ;;  %v1895_v15 = vpop.f32.mrf.mxu2 }
  0xb0   : > { %v1063_v14 = vpack.c.bf16 %v1007_v12, %v1007_v12 }
  0xb1   : > { %v720_v16 = vpop.f32.mrf.mxu0 }
  0xb2   : > { %1120 = vst.msk [vmem:[%s1893_s23] sm:$0xf] %vm1119_vm3, %v1063_v14  ;;  %v721_v17 = vadd.f32 %v1880_v2, %v720_v16 }
  0xb4   : > { %v870_v20 = vadd.f32 %v869_v56, %v721_v17  ;;  %v1370_v56 = vld [vmem:[%s1764_s30 + $0xa0] sm:$0xf] }
  0xb5   : > { %v1906_v26 = vpop.f32.mrf.mxu3 }
  0xb6   : > { %v1008_v27 = vmax.f32 %v870_v20, 0.0 }
  0xb7   : > { %v877_v28 = vpop.f32.mrf.mxu1  ;;  %v1910_v33 = vpop.f32.mrf.mxu2 }
  0xb8   : > { %v1064_v32 = vpack.c.bf16 %v1008_v27, %v1008_v27  ;;  %v1633_v27 = vld [vmem:[%s1764_s30 + $0x1b4] sm:$0xf] }
  0xb9   : > { %v723_v35 = vpop.f32.mrf.mxu0 }
  0xba   : > { %1558 = vmatmul.msk.bf16.gmra.mxu1 %vm617_vm2, %v1375_v23  ;;  %1121 = vst.msk [vmem:[%s1893_s23 + $0x4] sm:$0xf] %vm1119_vm3, %v1064_v32  ;;  %v724_v37 = vadd.f32 %v1880_v2, %v723_v35  ;;  %1573 = vmatmul.msk.bf16.gmra.mxu3 %vm617_vm2, %v1495_v31  ;;  %v1388_v23 = vld [vmem:[%s1764_s30 + $0xc8] sm:$0xf0]  ;;  %v1378_v31 = vld [vmem:[%s1764_s30 + $0xb0] sm:$0xf] }
  0xbb   : > { %v1391_v30 = vor.u32 %v1603_v22, %v1388_v23  ;;  %v1602_v32 = vld [vmem:[%s1764_s30 + $0xb4] sm:$0xf0] }
  0xbc   : > { %v873_v38 = vadd.f32 %v872_v1, %v724_v37  ;;  %762 = vmatmul.bf16.gmra.mxu0 %v1363_v34  ;;  %832 = vmatmul.bf16.gmra.mxu2 %v1475_v36  ;;  %v1490_v36 = vld [vmem:[%s1764_s30 + $0x190] sm:$0xf]  ;;  %v1630_v37 = vld [vmem:[%s1764_s30 + $0x194] sm:$0xf0] }
  0xbd   : > { %v1917_v39 = vpop.f32.mrf.mxu3 }
  0xbe   : > { %v1009_v40 = vmax.f32 %v873_v38, 0.0 }
  0xbf   : > { %v879_v41 = vpop.f32.mrf.mxu1  ;;  %v793_v43 = vpop.f32.mrf.mxu2 }
  0xc0   : > { %v1065_v42 = vpack.c.bf16 %v1009_v40, %v1009_v40  ;;  %v794_v44 = vadd.f32 %v1880_v2, %v793_v43 }
  0xc1   : > { %v725_v45 = vpop.f32.mrf.mxu0 }
  0xc2   : > { %1122 = vst.msk [vmem:[%s1893_s23 + $0x8] sm:$0xf] %vm1119_vm3, %v1065_v42  ;;  %v726_v46 = vadd.f32 %v1880_v2, %v725_v45  ;;  %v943_v49 = vadd.f32 %v1867_v55, %v794_v44  ;;  %v1371_v55 = vor.u32 %v1600_v57, %v1370_v56 }
  0xc4   : > { %v875_v50 = vadd.f32 %v874_v13, %v726_v46  ;;  %v1037_v53 = vmax.f32 %v943_v49, 0.0  ;;  %v1491_v46 = vor.u32 %v1630_v37, %v1490_v36 }
  0xc5   : > { %v1930_v58 = vpop.f32.mrf.mxu3 }
  0xc6   : > { %v1010_v59 = vmax.f32 %v875_v50, 0.0  ;;  %v1093_v1 = vpack.c.bf16 %v1037_v53, %v1037_v53 }
  0xc7   : > { %v882_v60 = vpop.f32.mrf.mxu1  ;;  %v795_v4 = vpop.f32.mrf.mxu2 }
  0xc8   : > { %v1066_v3 = vpack.c.bf16 %v1010_v59, %v1010_v59  ;;  %1150 = vst.msk [vmem:[%s1893_s23 + $0x78] sm:$0xf] %vm1119_vm3, %v1093_v1  ;;  %v796_v5 = vadd.f32 %v1880_v2, %v795_v4  ;;  %v1399_v4 = vor.u32 %v1605_v61, %v1396_v62 }
  0xc9   : > { %v728_v6 = vpop.f32.mrf.mxu0 }
  0xca   : > { %1559 = vmatmul.msk.bf16.gmra.mxu1 %vm617_vm2, %v1383_v54  ;;  %1123 = vst.msk [vmem:[%s1893_s23 + $0xc] sm:$0xf] %vm1119_vm3, %v1066_v3  ;;  %v729_v8 = vadd.f32 %v1880_v2, %v728_v6  ;;  %1574 = vmatmul.msk.bf16.gmra.mxu3 %vm617_vm2, %v1503_v63  ;;  %v945_v9 = vadd.f32 %v1875_v0, %v796_v5  ;;  %v1604_v5 = vld [vmem:[%s1764_s30 + $0xc4] sm:$0xf0] }
  0xcc   : > { %v878_v10 = vadd.f32 %v877_v28, %v729_v8  ;;  %767 = vmatmul.bf16.gmra.mxu0 %v1371_v55  ;;  %v1038_v12 = vmax.f32 %v945_v9, 0.0  ;;  %837 = vmatmul.bf16.gmra.mxu2 %v1483_v7  ;;  %v1508_v28 = vld [vmem:[%s1764_s30 + $0x1b8] sm:$0xf0]  ;;  %v1386_v55 = vld [vmem:[%s1764_s30 + $0xc0] sm:$0xf] }
  0xcd   : > { %v1943_v13 = vpop.f32.mrf.mxu3  ;;  %v1511_v40 = vor.u32 %v1633_v27, %v1508_v28  ;;  %v1498_v8 = vld [vmem:[%s1764_s30 + $0x1a0] sm:$0xf]  ;;  %v1632_v9 = vld [vmem:[%s1764_s30 + $0x1a4] sm:$0xf0] }
  0xce   : > { %v1011_v14 = vmax.f32 %v878_v10, 0.0  ;;  %v1094_v17 = vpack.c.bf16 %v1038_v12, %v1038_v12 }
  0xcf   : > { %v884_v16 = vpop.f32.mrf.mxu1  ;;  %v798_v19 = vpop.f32.mrf.mxu2 }
  0xd0   : > { %v1067_v18 = vpack.c.bf16 %v1011_v14, %v1011_v14  ;;  %1151 = vst.msk [vmem:[%s1893_s23 + $0x7c] sm:$0xf] %vm1119_vm3, %v1094_v17  ;;  %v799_v0 = vadd.f32 %v1880_v2, %v798_v19  ;;  %v1387_v17 = vor.u32 %v1604_v5, %v1386_v55 }
  0xd1   : > { %v730_v20 = vpop.f32.mrf.mxu0 }
  0xd2   : > { %1124 = vst.msk [vmem:[%s1893_s23 + $0x10] sm:$0xf] %vm1119_vm3, %v1067_v18  ;;  %v731_v21 = vadd.f32 %v1880_v2, %v730_v20  ;;  %v948_v24 = vadd.f32 %v1888_v11, %v799_v0  ;;  %v1379_v11 = vor.u32 %v1602_v32, %v1378_v31  ;;  %v1607_v31 = vld [vmem:[%s1764_s30 + $0xe4] sm:$0xf]  ;;  %v1404_v32 = vld [vmem:[%s1764_s30 + $0xe8] sm:$0xf0] }
  0xd4   : > { %v880_v25 = vadd.f32 %v879_v41, %v731_v21  ;;  %v1039_v29 = vmax.f32 %v948_v24, 0.0 }
  0xd5   : > { %v1960_v38 = vpop.f32.mrf.mxu3 }
  0xd6   : > { %v1012_v34 = vmax.f32 %v880_v25, 0.0  ;;  %v1095_v42 = vpack.c.bf16 %v1039_v29, %v1039_v29 }
  0xd7   : > { %v887_v35 = vpop.f32.mrf.mxu1  ;;  %v800_v44 = vpop.f32.mrf.mxu2 }
  0xd8   : > { %v1068_v43 = vpack.c.bf16 %v1012_v34, %v1012_v34  ;;  %1152 = vst.msk [vmem:[%s1893_s23 + $0x80] sm:$0xf] %vm1119_vm3, %v1095_v42  ;;  %v801_v41 = vadd.f32 %v1880_v2, %v800_v44  ;;  %v1394_v42 = vld [vmem:[%s1764_s30 + $0xd0] sm:$0xf] }
  0xd9   : > { %v733_v45 = vpop.f32.mrf.mxu0 }
  0xda   : > { %1560 = vmatmul.msk.bf16.gmra.mxu1 %vm617_vm2, %v1391_v30  ;;  %1125 = vst.msk [vmem:[%s1893_s23 + $0x14] sm:$0xf] %vm1119_vm3, %v1068_v43  ;;  %v734_v47 = vadd.f32 %v1880_v2, %v733_v45  ;;  %1575 = vmatmul.msk.bf16.gmra.mxu3 %vm617_vm2, %v1511_v40  ;;  %v950_v48 = vadd.f32 %v1906_v26, %v801_v41  ;;  %v1606_v43 = vld [vmem:[%s1764_s30 + $0xd4] sm:$0xf0]  ;;  %v1506_v41 = vld [vmem:[%s1764_s30 + $0x1b0] sm:$0xf] }
  0xdb   : > { %v1407_v40 = vor.u32 %v1607_v31, %v1404_v32  ;;  %v1634_v45 = vld [vmem:[%s1764_s30 + $0x1b4] sm:$0xf0] }
  0xdc   : > { %v883_v49 = vadd.f32 %v882_v60, %v734_v47  ;;  %772 = vmatmul.bf16.gmra.mxu0 %v1379_v11  ;;  %v1040_v50 = vmax.f32 %v950_v48, 0.0  ;;  %842 = vmatmul.bf16.gmra.mxu2 %v1491_v46 }
  0xdd   : > { %v1971_v57 = vpop.f32.mrf.mxu3 }
  0xde   : > { %v1013_v51 = vmax.f32 %v883_v49, 0.0  ;;  %v1096_v53 = vpack.c.bf16 %v1040_v50, %v1040_v50  ;;  %v1395_v49 = vor.u32 %v1606_v43, %v1394_v42 }
  0xdf   : > { %v889_v52 = vpop.f32.mrf.mxu1  ;;  %v803_v56 = vpop.f32.mrf.mxu2 }
  0xe0   : > { %v1069_v54 = vpack.c.bf16 %v1013_v51, %v1013_v51  ;;  %1153 = vst.msk [vmem:[%s1893_s23 + $0x84] sm:$0xf] %vm1119_vm3, %v1096_v53  ;;  %v804_v26 = vadd.f32 %v1880_v2, %v803_v56  ;;  %v1507_v51 = vor.u32 %v1634_v45, %v1506_v41 }
  0xe1   : > { %v735_v59 = vpop.f32.mrf.mxu0 }
  0xe2   : > { %1126 = vst.msk [vmem:[%s1893_s23 + $0x18] sm:$0xf] %vm1119_vm3, %v1069_v54  ;;  %v736_v60 = vadd.f32 %v1880_v2, %v735_v59  ;;  %v953_v63 = vadd.f32 %v1917_v39, %v804_v26 }
  0xe4   : > { %v885_v1 = vadd.f32 %v884_v16, %v736_v60  ;;  %v1041_v3 = vmax.f32 %v953_v63, 0.0  ;;  %v1499_v16 = vor.u32 %v1632_v9, %v1498_v8 }
  0xe5   : > { %v1993_v0 = vpop.f32.mrf.mxu3 }
  0xe6   : > { %v1014_v6 = vmax.f32 %v885_v1, 0.0  ;;  %v1097_v10 = vpack.c.bf16 %v1041_v3, %v1041_v3 }
  0xe7   : > { %v892_v7 = vpop.f32.mrf.mxu1  ;;  %v805_v14 = vpop.f32.mrf.mxu2 }
  0xe8   : > { %v1070_v12 = vpack.c.bf16 %v1014_v6, %v1014_v6  ;;  %1154 = vst.msk [vmem:[%s1893_s23 + $0x88] sm:$0xf] %vm1119_vm3, %v1097_v10  ;;  %v806_v18 = vadd.f32 %v1880_v2, %v805_v14 }
  0xe9   : > { %v738_v39 = vpop.f32.mrf.mxu0 }
  0xea   : > { %1561 = vmatmul.msk.bf16.gmra.mxu1 %vm617_vm2, %v1399_v4  ;;  %1127 = vst.msk [vmem:[%s1893_s23 + $0x1c] sm:$0xf] %vm1119_vm3, %v1070_v12  ;;  %v739_v19 = vadd.f32 %v1880_v2, %v738_v39  ;;  %v955_v20 = vadd.f32 %v1930_v58, %v806_v18 }
  0xec   : > { %v888_v21 = vadd.f32 %v887_v35, %v739_v19  ;;  %777 = vmatmul.bf16.gmra.mxu0 %v1387_v17  ;;  %v1042_v22 = vmax.f32 %v955_v20, 0.0  ;;  %847 = vmatmul.bf16.gmra.mxu2 %v1499_v16 }
  0xed   : > { %v2005_v36 = vpop.f32.mrf.mxu3 }
  0xee   : > { %v1015_v23 = vmax.f32 %v888_v21, 0.0  ;;  %v1098_v25 = vpack.c.bf16 %v1042_v22, %v1042_v22 }
  0xef   : > { %v894_v24 = vpop.f32.mrf.mxu1  ;;  %v808_v28 = vpop.f32.mrf.mxu2 }
  0xf0   : > { %v1071_v27 = vpack.c.bf16 %v1015_v23, %v1015_v23  ;;  %1155 = vst.msk [vmem:[%s1893_s23 + $0x8c] sm:$0xf] %vm1119_vm3, %v1098_v25  ;;  %v809_v29 = vadd.f32 %v1880_v2, %v808_v28 }
  0xf1   : > { %v740_v30 = vpop.f32.mrf.mxu0 }
  0xf2   : > { %1128 = vst.msk [vmem:[%s1893_s23 + $0x20] sm:$0xf] %vm1119_vm3, %v1071_v27  ;;  %v741_v58 = vadd.f32 %v1880_v2, %v740_v30  ;;  %v958_v34 = vadd.f32 %v1943_v13, %v809_v29 }
  0xf4   : > { %v890_v35 = vadd.f32 %v889_v52, %v741_v58  ;;  %v1043_v37 = vmax.f32 %v958_v34, 0.0 }
  0xf5   : > { %v969_v60 = vpop.f32.mrf.mxu3 }
  0xf6   : > { %v1016_v44 = vmax.f32 %v890_v35, 0.0  ;;  %v1099_v46 = vpack.c.bf16 %v1043_v37, %v1043_v37 }
  0xf7   : > { %v897_v11 = vpop.f32.mrf.mxu1  ;;  %v810_v48 = vpop.f32.mrf.mxu2 }
  0xf8   : > { %v1072_v47 = vpack.c.bf16 %v1016_v44, %v1016_v44  ;;  %1156 = vst.msk [vmem:[%s1893_s23 + $0x90] sm:$0xf] %vm1119_vm3, %v1099_v46  ;;  %v811_v13 = vadd.f32 %v1880_v2, %v810_v48 }
  0xf9   : > { %v743_v50 = vpop.f32.mrf.mxu0 }
  0xfa   : > { %1562 = vmatmul.msk.bf16.gmra.mxu1 %vm617_vm2, %v1407_v40  ;;  %1129 = vst.msk [vmem:[%s1893_s23 + $0x24] sm:$0xf] %vm1119_vm3, %v1072_v47  ;;  %v744_v52 = vadd.f32 %v1880_v2, %v743_v50  ;;  %v960_v53 = vadd.f32 %v1960_v38, %v811_v13 }
  0xfc   : > { %v893_v54 = vadd.f32 %v892_v7, %v744_v52  ;;  %782 = vmatmul.bf16.gmra.mxu0 %v1395_v49  ;;  %v1044_v56 = vmax.f32 %v960_v53, 0.0  ;;  %852 = vmatmul.bf16.gmra.mxu2 %v1507_v51 }
  0xfd   : > { %v972_v12 = vpop.f32.mrf.mxu3 }
  0xfe   : > { %v1017_v26 = vmax.f32 %v893_v54, 0.0  ;;  %v1100_v61 = vpack.c.bf16 %v1044_v56, %v1044_v56 }
  0xff   : > { %v899_v59 = vpop.f32.mrf.mxu1  ;;  %v813_v63 = vpop.f32.mrf.mxu2 }
 0x100   : > { %v1073_v62 = vpack.c.bf16 %v1017_v26, %v1017_v26  ;;  %1157 = vst.msk [vmem:[%s1893_s23 + $0x94] sm:$0xf] %vm1119_vm3, %v1100_v61  ;;  %v814_v1 = vadd.f32 %v1880_v2, %v813_v63 }
 0x101   : > { %v745_v3 = vpop.f32.mrf.mxu0 }
 0x102   : > { %1130 = vst.msk [vmem:[%s1893_s23 + $0x28] sm:$0xf] %vm1119_vm3, %v1073_v62  ;;  %v746_v38 = vadd.f32 %v1880_v2, %v745_v3  ;;  %v963_v4 = vadd.f32 %v1971_v57, %v814_v1 }
 0x104   : > { %v895_v55 = vadd.f32 %v894_v24, %v746_v38  ;;  %v1045_v5 = vmax.f32 %v963_v4, 0.0 }
 0x105   : > { %v974_v28 = vpop.f32.mrf.mxu3 }
 0x106   : > { %v1018_v6 = vmax.f32 %v895_v55, 0.0  ;;  %v1101_v8 = vpack.c.bf16 %v1045_v5, %v1045_v5 }
 0x107   : > { %v902_v7 = vpop.f32.mrf.mxu1  ;;  %v815_v10 = vpop.f32.mrf.mxu2 }
 0x108   : > { %v1074_v9 = vpack.c.bf16 %v1018_v6, %v1018_v6  ;;  %1158 = vst.msk [vmem:[%s1893_s23 + $0x98] sm:$0xf] %vm1119_vm3, %v1101_v8  ;;  %v816_v14 = vadd.f32 %v1880_v2, %v815_v10 }
 0x109   : > { %v748_v17 = vpop.f32.mrf.mxu0 }
 0x10a   : > { %1131 = vst.msk [vmem:[%s1893_s23 + $0x2c] sm:$0xf] %vm1119_vm3, %v1074_v9  ;;  %v749_v18 = vadd.f32 %v1880_v2, %v748_v17  ;;  %v965_v57 = vadd.f32 %v1993_v0, %v816_v14 }
 0x10c   : > { %v898_v39 = vadd.f32 %v897_v11, %v749_v18  ;;  %v1046_v16 = vmax.f32 %v965_v57, 0.0 }
 0x10d   : > { %v977_v44 = vpop.f32.mrf.mxu3 }
 0x10e   : > { %v1019_v19 = vmax.f32 %v898_v39, 0.0  ;;  %v1102_v21 = vpack.c.bf16 %v1046_v16, %v1046_v16 }
 0x10f   : > { %v904_v20 = vpop.f32.mrf.mxu1  ;;  %v818_v23 = vpop.f32.mrf.mxu2 }
 0x110   : > { %v1075_v22 = vpack.c.bf16 %v1019_v19, %v1019_v19  ;;  %1159 = vst.msk [vmem:[%s1893_s23 + $0x9c] sm:$0xf] %vm1119_vm3, %v1102_v21  ;;  %v819_v24 = vadd.f32 %v1880_v2, %v818_v23 }
 0x111   : > { %v750_v25 = vpop.f32.mrf.mxu0 }
 0x112   : > { %1132 = vst.msk [vmem:[%s1893_s23 + $0x30] sm:$0xf] %vm1119_vm3, %v1075_v22  ;;  %v751_v27 = vadd.f32 %v1880_v2, %v750_v25  ;;  %v968_v0 = vadd.f32 %v2005_v36, %v819_v24 }
 0x114   : > { %v900_v29 = vadd.f32 %v899_v59, %v751_v27  ;;  %v1047_v30 = vmax.f32 %v968_v0, 0.0 }
 0x115   : > { %v979_v26 = vpop.f32.mrf.mxu3 }
 0x116   : > { %v1020_v58 = vmax.f32 %v900_v29, 0.0  ;;  %v1103_v32 = vpack.c.bf16 %v1047_v30, %v1047_v30 }
 0x117   : > { %v907_v31 = vpop.f32.mrf.mxu1  ;;  %v820_v35 = vpop.f32.mrf.mxu2 }
 0x118   : > { %v1076_v34 = vpack.c.bf16 %v1020_v58, %v1020_v58  ;;  %1160 = vst.msk [vmem:[%s1893_s23 + $0xa0] sm:$0xf] %vm1119_vm3, %v1103_v32  ;;  %v821_v37 = vadd.f32 %v1880_v2, %v820_v35 }
 0x119   : > { %v753_v40 = vpop.f32.mrf.mxu0 }
 0x11a   : > { %1133 = vst.msk [vmem:[%s1893_s23 + $0x34] sm:$0xf] %vm1119_vm3, %v1076_v34  ;;  %v754_v42 = vadd.f32 %v1880_v2, %v753_v40  ;;  %v970_v43 = vadd.f32 %v969_v60, %v821_v37 }
 0x11c   : > { %v903_v36 = vadd.f32 %v902_v7, %v754_v42  ;;  %v1048_v11 = vmax.f32 %v970_v43, 0.0 }
 0x11d   : > { %v982_v9 = vpop.f32.mrf.mxu3 }
 0x11e   : > { %v1021_v41 = vmax.f32 %v903_v36, 0.0  ;;  %v1104_v46 = vpack.c.bf16 %v1048_v11, %v1048_v11 }
 0x11f   : > { %v909_v45 = vpop.f32.mrf.mxu1  ;;  %v823_v48 = vpop.f32.mrf.mxu2 }
 0x120   : > { %v1077_v47 = vpack.c.bf16 %v1021_v41, %v1021_v41  ;;  %1161 = vst.msk [vmem:[%s1893_s23 + $0xa4] sm:$0xf] %vm1119_vm3, %v1104_v46  ;;  %v824_v49 = vadd.f32 %v1880_v2, %v823_v48 }
 0x121   : > { %v755_v13 = vpop.f32.mrf.mxu0 }
 0x122   : > { %1134 = vst.msk [vmem:[%s1893_s23 + $0x38] sm:$0xf] %vm1119_vm3, %v1077_v47  ;;  %v756_v50 = vadd.f32 %v1880_v2, %v755_v13  ;;  %v973_v51 = vadd.f32 %v972_v12, %v824_v49 }
 0x124   : > { %v905_v52 = vadd.f32 %v904_v20, %v756_v50  ;;  %v1049_v53 = vmax.f32 %v973_v51, 0.0 }
 0x125   : > { %v984_v25 = vpop.f32.mrf.mxu3 }
 0x126   : > { %v1022_v54 = vmax.f32 %v905_v52, 0.0  ;;  %v1105_v59 = vpack.c.bf16 %v1049_v53, %v1049_v53 }
 0x127   : > { %v912_v56 = vpop.f32.mrf.mxu1  ;;  %v825_v61 = vpop.f32.mrf.mxu2 }
 0x128   : > { %v1078_v60 = vpack.c.bf16 %v1022_v54, %v1022_v54  ;;  %1162 = vst.msk [vmem:[%s1893_s23 + $0xa8] sm:$0xf] %vm1119_vm3, %v1105_v59  ;;  %v826_v62 = vadd.f32 %v1880_v2, %v825_v61 }
 0x129   : > { %v758_v63 = vpop.f32.mrf.mxu0 }
 0x12a   : > { %1135 = vst.msk [vmem:[%s1893_s23 + $0x3c] sm:$0xf] %vm1119_vm3, %v1078_v60  ;;  %v759_v1 = vadd.f32 %v1880_v2, %v758_v63  ;;  %v975_v3 = vadd.f32 %v974_v28, %v826_v62 }
 0x12c   : > { %v908_v38 = vadd.f32 %v907_v31, %v759_v1  ;;  %v1050_v4 = vmax.f32 %v975_v3, 0.0 }
 0x12d   : > { %v987_v43 = vpop.f32.mrf.mxu3 }
 0x12e   : > { %v1023_v55 = vmax.f32 %v908_v38, 0.0  ;;  %v1106_v6 = vpack.c.bf16 %v1050_v4, %v1050_v4 }
 0x12f   : > { %v914_v5 = vpop.f32.mrf.mxu1  ;;  %v828_v8 = vpop.f32.mrf.mxu2 }
 0x130   : > { %v1079_v7 = vpack.c.bf16 %v1023_v55, %v1023_v55  ;;  %1163 = vst.msk [vmem:[%s1893_s23 + $0xac] sm:$0xf] %vm1119_vm3, %v1106_v6  ;;  %v829_v10 = vadd.f32 %v1880_v2, %v828_v8 }
 0x131   : > { %v760_v12 = vpop.f32.mrf.mxu0 }
 0x132   : > { %1136 = vst.msk [vmem:[%s1893_s23 + $0x40] sm:$0xf] %vm1119_vm3, %v1079_v7  ;;  %v761_v14 = vadd.f32 %v1880_v2, %v760_v12  ;;  %v978_v17 = vadd.f32 %v977_v44, %v829_v10 }
 0x134   : > { %v910_v18 = vadd.f32 %v909_v45, %v761_v14  ;;  %v1051_v57 = vmax.f32 %v978_v17, 0.0 }
 0x135   : > { %v989_v54 = vpop.f32.mrf.mxu3 }
 0x136   : > { %v1024_v39 = vmax.f32 %v910_v18, 0.0  ;;  %v1107_v19 = vpack.c.bf16 %v1051_v57, %v1051_v57 }
 0x137   : > { %v917_v16 = vpop.f32.mrf.mxu1  ;;  %v830_v21 = vpop.f32.mrf.mxu2 }
 0x138   : > { %v1080_v20 = vpack.c.bf16 %v1024_v39, %v1024_v39  ;;  %1164 = vst.msk [vmem:[%s1893_s23 + $0xb0] sm:$0xf] %vm1119_vm3, %v1107_v19  ;;  %v831_v22 = vadd.f32 %v1880_v2, %v830_v21 }
 0x139   : > { %v763_v23 = vpop.f32.mrf.mxu0 }
 0x13a   : > { %1137 = vst.msk [vmem:[%s1893_s23 + $0x44] sm:$0xf] %vm1119_vm3, %v1080_v20  ;;  %v764_v24 = vadd.f32 %v1880_v2, %v763_v23  ;;  %v980_v27 = vadd.f32 %v979_v26, %v831_v22 }
 0x13c   : > { %v913_v28 = vadd.f32 %v912_v56, %v764_v24  ;;  %v1052_v0 = vmax.f32 %v980_v27, 0.0 }
 0x13d   : > { %v992_v7 = vpop.f32.mrf.mxu3 }
 0x13e   : > { %v1025_v29 = vmax.f32 %v913_v28, 0.0  ;;  %v1108_v58 = vpack.c.bf16 %v1052_v0, %v1052_v0 }
 0x13f   : > { %v919_v30 = vpop.f32.mrf.mxu1  ;;  %v833_v32 = vpop.f32.mrf.mxu2 }
 0x140   : > { %v1081_v31 = vpack.c.bf16 %v1025_v29, %v1025_v29  ;;  %1165 = vst.msk [vmem:[%s1893_s23 + $0xb4] sm:$0xf] %vm1119_vm3, %v1108_v58  ;;  %v834_v34 = vadd.f32 %v1880_v2, %v833_v32 }
 0x141   : > { %v765_v35 = vpop.f32.mrf.mxu0 }
 0x142   : > { %1138 = vst.msk [vmem:[%s1893_s23 + $0x48] sm:$0xf] %vm1119_vm3, %v1081_v31  ;;  %v766_v37 = vadd.f32 %v1880_v2, %v765_v35  ;;  %v983_v40 = vadd.f32 %v982_v9, %v834_v34 }
 0x144   : > { %v915_v42 = vadd.f32 %v914_v5, %v766_v37  ;;  %v1053_v36 = vmax.f32 %v983_v40, 0.0 }
 0x145   : > { %v994_v23 = vpop.f32.mrf.mxu3 }
 0x146   : > { %v1026_v44 = vmax.f32 %v915_v42, 0.0  ;;  %v1109_v41 = vpack.c.bf16 %v1053_v36, %v1053_v36 }
 0x147   : > { %v922_v11 = vpop.f32.mrf.mxu1  ;;  %v835_v46 = vpop.f32.mrf.mxu2 }
 0x148   : > { %v1082_v45 = vpack.c.bf16 %v1026_v44, %v1026_v44  ;;  %1166 = vst.msk [vmem:[%s1893_s23 + $0xb8] sm:$0xf] %vm1119_vm3, %v1109_v41  ;;  %v836_v47 = vadd.f32 %v1880_v2, %v835_v46 }
 0x149   : > { %v768_v48 = vpop.f32.mrf.mxu0 }
 0x14a   : > { %1139 = vst.msk [vmem:[%s1893_s23 + $0x4c] sm:$0xf] %vm1119_vm3, %v1082_v45  ;;  %v769_v49 = vadd.f32 %v1880_v2, %v768_v48  ;;  %v985_v13 = vadd.f32 %v984_v25, %v836_v47 }
 0x14c   : > { %v918_v50 = vadd.f32 %v917_v16, %v769_v49  ;;  %v1054_v51 = vmax.f32 %v985_v13, 0.0  ;;  %v789_v13 = vadd.f32 %v1880_v2, %v1895_v15 }
 0x14d   : > { %v997_v40 = vpop.f32.mrf.mxu3 }
 0x14e   : > { %v1027_v52 = vmax.f32 %v918_v50, 0.0  ;;  %v1110_v56 = vpack.c.bf16 %v1054_v51, %v1054_v51 }
 0x14f   : > { %v924_v53 = vpop.f32.mrf.mxu1  ;;  %v838_v59 = vpop.f32.mrf.mxu2 }
 0x150   : > { %v1083_v26 = vpack.c.bf16 %v1027_v52, %v1027_v52  ;;  %1167 = vst.msk [vmem:[%s1893_s23 + $0xbc] sm:$0xf] %vm1119_vm3, %v1110_v56  ;;  %v839_v60 = vadd.f32 %v1880_v2, %v838_v59 }
 0x151   : > { %v770_v61 = vpop.f32.mrf.mxu0 }
 0x152   : > { %1140 = vst.msk [vmem:[%s1893_s23 + $0x50] sm:$0xf] %vm1119_vm3, %v1083_v26  ;;  %v771_v62 = vadd.f32 %v1880_v2, %v770_v61  ;;  %v988_v63 = vadd.f32 %v987_v43, %v839_v60 }
 0x154   : > { %v920_v1 = vadd.f32 %v919_v30, %v771_v62  ;;  %v1055_v3 = vmax.f32 %v988_v63, 0.0 }
 0x155   : > { %v999_v52 = vpop.f32.mrf.mxu3 }
 0x156   : > { %v1028_v38 = vmax.f32 %v920_v1, 0.0  ;;  %v1111_v55 = vpack.c.bf16 %v1055_v3, %v1055_v3 }
 0x157   : > { %v927_v4 = vpop.f32.mrf.mxu1  ;;  %v840_v6 = vpop.f32.mrf.mxu2 }
 0x158   : > { %v1084_v5 = vpack.c.bf16 %v1028_v38, %v1028_v38  ;;  %1168 = vst.msk [vmem:[%s1893_s23 + $0xc0] sm:$0xf] %vm1119_vm3, %v1111_v55  ;;  %v841_v8 = vadd.f32 %v1880_v2, %v840_v6  ;;  %v791_v38 = vadd.f32 %v1880_v2, %v1910_v33 }
 0x159   : > { %v773_v9 = vpop.f32.mrf.mxu0 }
 0x15a   : > { %1141 = vst.msk [vmem:[%s1893_s23 + $0x54] sm:$0xf] %vm1119_vm3, %v1084_v5  ;;  %v774_v10 = vadd.f32 %v1880_v2, %v773_v9  ;;  %v990_v12 = vadd.f32 %v989_v54, %v841_v8 }
 0x15c   : > { %v923_v14 = vadd.f32 %v922_v11, %v774_v10  ;;  %v1056_v17 = vmax.f32 %v990_v12, 0.0 }
 0x15d   : > { %v1002_v9 = vpop.f32.mrf.mxu3 }
 0x15e   : > { %v1029_v18 = vmax.f32 %v923_v14, 0.0  ;;  %v1112_v39 = vpack.c.bf16 %v1056_v17, %v1056_v17 }
 0x15f   : > { %v929_v57 = vpop.f32.mrf.mxu1  ;;  %v843_v19 = vpop.f32.mrf.mxu2 }
 0x160   : > { %v1085_v16 = vpack.c.bf16 %v1029_v18, %v1029_v18  ;;  %1169 = vst.msk [vmem:[%s1893_s23 + $0xc4] sm:$0xf] %vm1119_vm3, %v1112_v39  ;;  %v844_v20 = vadd.f32 %v1880_v2, %v843_v19 }
 0x161   : > { %v775_v21 = vpop.f32.mrf.mxu0 }
 0x162   : > { %1142 = vst.msk [vmem:[%s1893_s23 + $0x58] sm:$0xf] %vm1119_vm3, %v1085_v16  ;;  %v776_v22 = vadd.f32 %v1880_v2, %v775_v21  ;;  %v993_v24 = vadd.f32 %v992_v7, %v844_v20 }
 0x164   : > { %v925_v25 = vadd.f32 %v924_v53, %v776_v22  ;;  %v1057_v27 = vmax.f32 %v993_v24, 0.0 }
 0x165   : > { %v1004_v24 = vpop.f32.mrf.mxu3 }
 0x166   : > { %v1030_v28 = vmax.f32 %v925_v25, 0.0  ;;  %v1113_v29 = vpack.c.bf16 %v1057_v27, %v1057_v27 }
 0x167   : > { %v932_v0 = vpop.f32.mrf.mxu1  ;;  %v845_v58 = vpop.f32.mrf.mxu2 }
 0x168   : > { %v1086_v30 = vpack.c.bf16 %v1030_v28, %v1030_v28  ;;  %1170 = vst.msk [vmem:[%s1893_s23 + $0xc8] sm:$0xf] %vm1119_vm3, %v1113_v29  ;;  %v846_v31 = vadd.f32 %v1880_v2, %v845_v58 }
 0x169   : > { %v778_v32 = vpop.f32.mrf.mxu0 }
 0x16a   : > { %1143 = vst.msk [vmem:[%s1893_s23 + $0x5c] sm:$0xf] %vm1119_vm3, %v1086_v30  ;;  %v779_v34 = vadd.f32 %v1880_v2, %v778_v32  ;;  %v995_v35 = vadd.f32 %v994_v23, %v846_v31 }
 0x16c   : > { %v928_v37 = vadd.f32 %v927_v4, %v779_v34  ;;  %v1058_v42 = vmax.f32 %v995_v35, 0.0 }
 0x16e   : > { %v1031_v43 = vmax.f32 %v928_v37, 0.0  ;;  %v1114_v44 = vpack.c.bf16 %v1058_v42, %v1058_v42 }
 0x16f   : > { %v934_v36 = vpop.f32.mrf.mxu1  ;;  %v848_v41 = vpop.f32.mrf.mxu2 }
 0x170   : > { %v1087_v11 = vpack.c.bf16 %v1031_v43, %v1031_v43  ;;  %1171 = vst.msk [vmem:[%s1893_s23 + $0xcc] sm:$0xf] %vm1119_vm3, %v1114_v44  ;;  %v849_v45 = vadd.f32 %v1880_v2, %v848_v41 }
 0x171   : > { %v780_v46 = vpop.f32.mrf.mxu0 }
 0x172   : > { %1144 = vst.msk [vmem:[%s1893_s23 + $0x60] sm:$0xf] %vm1119_vm3, %v1087_v11  ;;  %v781_v47 = vadd.f32 %v1880_v2, %v780_v46  ;;  %v998_v48 = vadd.f32 %v997_v40, %v849_v45 }
 0x174   : > { %v930_v49 = vadd.f32 %v929_v57, %v781_v47  ;;  %v1059_v50 = vmax.f32 %v998_v48, 0.0 }
 0x176   : > { %v1032_v51 = vmax.f32 %v930_v49, 0.0  ;;  %v1115_v54 = vpack.c.bf16 %v1059_v50, %v1059_v50 }
 0x177   : > { %v937_v53 = vpop.f32.mrf.mxu1  ;;  %v850_v59 = vpop.f32.mrf.mxu2 }
 0x178   : > { %v938_v56 = vadd.f32 %v937_v53, %v789_v13  ;;  %v1088_v26 = vpack.c.bf16 %v1032_v51, %v1032_v51  ;;  %1172 = vst.msk [vmem:[%s1893_s23 + $0xd0] sm:$0xf] %vm1119_vm3, %v1115_v54  ;;  %v851_v61 = vadd.f32 %v1880_v2, %v850_v59 }
 0x179   : > { %v783_v62 = vpop.f32.mrf.mxu0 }
 0x17a   : > { %v1035_v60 = vmax.f32 %v938_v56, 0.0  ;;  %1145 = vst.msk [vmem:[%s1893_s23 + $0x64] sm:$0xf] %vm1119_vm3, %v1088_v26  ;;  %v784_v15 = vadd.f32 %v1880_v2, %v783_v62  ;;  %v1000_v1 = vadd.f32 %v999_v52, %v851_v61 }
 0x17c   : > { %v1091_v63 = vpack.c.bf16 %v1035_v60, %v1035_v60  ;;  %v933_v3 = vadd.f32 %v932_v0, %v784_v15  ;;  %v1060_v4 = vmax.f32 %v1000_v1, 0.0 }
 0x17e   : > { %1148 = vst.msk [vmem:[%s1893_s23 + $0x70] sm:$0xf] %vm1119_vm3, %v1091_v63  ;;  %v1033_v55 = vmax.f32 %v933_v3, 0.0  ;;  %v1116_v6 = vpack.c.bf16 %v1060_v4, %v1060_v4 }
 0x17f   : > { %v939_v5 = vpop.f32.mrf.mxu1  ;;  %v853_v10 = vpop.f32.mrf.mxu2 }
 0x180   : > { %v940_v7 = vadd.f32 %v939_v5, %v791_v38  ;;  %v1089_v8 = vpack.c.bf16 %v1033_v55, %v1033_v55  ;;  %1173 = vst.msk [vmem:[%s1893_s23 + $0xd4] sm:$0xf] %vm1119_vm3, %v1116_v6  ;;  %v854_v14 = vadd.f32 %v1880_v2, %v853_v10 }
 0x181   : > { %v785_v17 = vpop.f32.mrf.mxu0 }
 0x182   : > { %v1036_v12 = vmax.f32 %v940_v7, 0.0  ;;  %1146 = vst.msk [vmem:[%s1893_s23 + $0x68] sm:$0xf] %vm1119_vm3, %v1089_v8  ;;  %v786_v33 = vadd.f32 %v1880_v2, %v785_v17  ;;  %v1003_v57 = vadd.f32 %v1002_v9, %v854_v14 }
 0x184   : > { %v1092_v18 = vpack.c.bf16 %v1036_v12, %v1036_v12  ;;  %v935_v39 = vadd.f32 %v934_v36, %v786_v33  ;;  %v1061_v16 = vmax.f32 %v1003_v57, 0.0 }
 0x186   : > { %1149 = vst.msk [vmem:[%s1893_s23 + $0x74] sm:$0xf] %vm1119_vm3, %v1092_v18  ;;  %v1034_v19 = vmax.f32 %v935_v39, 0.0  ;;  %v1117_v20 = vpack.c.bf16 %v1061_v16, %v1061_v16 }
 0x187   : > { %v855_v22 = vpop.f32.mrf.mxu2 }
 0x188   : > { %v1090_v21 = vpack.c.bf16 %v1034_v19, %v1034_v19  ;;  %1174 = vst.msk [vmem:[%s1893_s23 + $0xd8] sm:$0xf] %vm1119_vm3, %v1117_v20  ;;  %v856_v23 = vadd.f32 %v1880_v2, %v855_v22 }
 0x18a   : > { %1147 = vst.msk [vmem:[%s1893_s23 + $0x6c] sm:$0xf] %vm1119_vm3, %v1090_v21  ;;  %v1005_v25 = vadd.f32 %v1004_v24, %v856_v23 }
 0x18c   : > { %v1062_v27 = vmax.f32 %v1005_v25, 0.0 }
 0x18e   : > { %v1118_v28 = vpack.c.bf16 %v1062_v27, %v1062_v27 }
 0x190   : > { %1175 = vst.msk [vmem:[%s1893_s23 + $0xdc] sm:$0xf] %vm1119_vm3, %v1118_v28 }
 0x191 PF: > { %s13_s14 = sadd.s32 1, %s1702_s14   ;;  %s2152_s12 = smov %s1698_s13 }
 0x192   : > { %p10_p5 = scmp.ge.s32.totalorder %s13_s14, 30   ;;  %s2153_s13 = smov %s2155_s15 }
 0x194   :  { %12 = sbr.rel (!%p10_p5) target bundleno = 2 (0x2), region = 68 }

</bundles_post_ra>
